<compile_context>
chip_gen: v6e
topology: v6e:2x2x1
jax: 0.10.0
libtpu: 0.0.40
codegen_flags: <defaults>
</compile_context>

<pallas_src>
import functools

import jax
import jax.numpy as jnp
from jax.experimental import pallas as pl
from jax.experimental.pallas import tpu as pltpu

_LANE = 128
_VMEM_BUDGET = 24 * 1024 * 1024   # double-buffered input tiles kept under this
_TARGET_STEP_BYTES = 1 * 1024 * 1024
_DBL = 4                          # 2 operands x 2 pipeline buffers


def _round_up(x, m):
    return (x + m - 1) // m * m


def _com_kernel(h_ref, g_ref, o_ref, acc_ref, *, flip):
    # h_ref:   (TB, J, TK)  heatmap tile
    # g_ref:   (TB, G, TK)  coordinate-grid tile
    # o_ref:   (TB, J, G)   output tile (written once, on the last spatial step)
    # acc_ref: (TB, J, G)   f32 accumulator (persists across the reduction axis)
    k = pl.program_id(1)

    @pl.when(k == 0)
    def _():
        acc_ref[...] = jnp.zeros_like(acc_ref)

    h = h_ref[...].astype(jnp.float32)          # (TB, J, TK)
    g = g_ref[...].astype(jnp.float32)          # (TB, G, TK)

    G = g_ref.shape[1]
    # G is tiny: per-coordinate sublane-broadcast multiply (VPU) + lane reduce (XLU).
    cols = [
        jnp.sum(h * g[:, c:c + 1, :], axis=-1, keepdims=True)   # (TB, J, 1)
        for c in range(G)
    ]
    if flip:  # torch.flip(coms, dims=[2]) baked into the column order — free.
        cols = cols[::-1]
    acc_ref[...] += jnp.concatenate(cols, axis=-1)               # (TB, J, G)

    @pl.when(k == pl.num_programs(1) - 1)
    def _():
        o_ref[...] = acc_ref[...].astype(o_ref.dtype)


def _choose_tiles(B, J, G, HW, itemsize):
    """Pick (TB, TK): batch-block size and lane-aligned spatial-block size."""
    # VMEM sublane footprint per batch element (rows pad to multiples of 8).
    vmem_rows = _round_up(J, 8) + _round_up(G, 8)
    hbm_rows = J + G

    # Spatial tile: largest lane-aligned divisor of HW whose double-buffered
    # tile fits the budget at TB == 1 (full-extent block is always legal).
    if HW % _LANE != 0:
        tk = HW
    else:
        cap = max(_LANE, (_VMEM_BUDGET // (_DBL * vmem_rows * itemsize)) // _LANE * _LANE)
        tk = min(HW, cap)
        while tk > _LANE and HW % tk != 0:
            tk -= _LANE
        if HW % tk != 0:
            tk = HW

    # Batch tile: grow over divisors of B until the per-step DMA reaches the
    # target size, staying under the VMEM budget.  Keep >= 2 batch blocks when
    # B >= 2 so the "parallel" axis can still be sharded across TensorCores.
    max_tb = B if B < 2 else max(1, B // 2)
    tb = 1
    for d in range(1, max_tb + 1):
        if B % d:
            continue
        if _DBL * d * vmem_rows * tk * itemsize > _VMEM_BUDGET:
            break
        tb = d
        if d * hbm_rows * tk * itemsize >= _TARGET_STEP_BYTES:
            break
    return tb, tk


def center_of_mass(grid, heatmaps, *, flip=True):
    B, G, H, W = grid.shape
    Bh, J, Hh, Wh = heatmaps.shape
    assert (B, H, W) == (Bh, Hh, Wh), "grid / heatmaps spatial+batch mismatch"
    HW = H * W

    in_dtype = jnp.promote_types(grid.dtype, heatmaps.dtype)
    out_dtype = jnp.promote_types(in_dtype, jnp.float32)
    itemsize = jnp.dtype(in_dtype).itemsize

    h2 = heatmaps.reshape(B, J, HW).astype(in_dtype)
    g2 = grid.reshape(B, G, HW).astype(in_dtype)

    # If HW is not lane aligned and a full-extent spatial block would blow the VMEM
    # budget, zero-pad the spatial axis (zero heatmap weight contributes nothing).
    vmem_rows = _round_up(J, 8) + _round_up(G, 8)
    if HW % _LANE != 0 and _DBL * vmem_rows * HW * itemsize > _VMEM_BUDGET:
        hw_pad = _round_up(HW, _LANE)
        h2 = jnp.pad(h2, ((0, 0), (0, 0), (0, hw_pad - HW)))
        g2 = jnp.pad(g2, ((0, 0), (0, 0), (0, hw_pad - HW)))
        HW = hw_pad

    TB, TK = _choose_tiles(B, J, G, HW, itemsize)
    num_b = B // TB
    num_k = HW // TK

    cost = pl.CostEstimate(
        flops=2 * B * J * G * HW,
        transcendentals=0,
        bytes_accessed=B * (J + G) * HW * itemsize
        + B * J * G * jnp.dtype(out_dtype).itemsize,
    )

    kernel = functools.partial(_com_kernel, flip=flip)

    out = pl.pallas_call(
        kernel,
        out_shape=jax.ShapeDtypeStruct((B, J, G), out_dtype),
        grid_spec=pltpu.PrefetchScalarGridSpec(
            num_scalar_prefetch=0,
            grid=(num_b, num_k),
            in_specs=[
                pl.BlockSpec((TB, J, TK), lambda b, k: (b, 0, k)),
                pl.BlockSpec((TB, G, TK), lambda b, k: (b, 0, k)),
            ],
            out_specs=pl.BlockSpec((TB, J, G), lambda b, k: (b, 0, 0)),
            scratch_shapes=[pltpu.VMEM((TB, J, G), jnp.float32)],
        ),
        compiler_params=pltpu.CompilerParams(
            dimension_semantics=("parallel", "arbitrary"),
            vmem_limit_bytes=48 * 1024 * 1024,
        ),
        cost_estimate=cost,
    )(h2, g2)

    return out


if __name__ == "__main__":
    key = jax.random.PRNGKey(0)
    k1, k2 = jax.random.split(key)

    B, J, G, H, W = 2, 4, 2, 16, 16

    # heatmaps: softmax-normalized per channel so they behave like distributions
    logits = jax.random.normal(k1, (B, J, H, W), dtype=jnp.float32)
    heatmaps = jax.nn.softmax(logits.reshape(B, J, H * W), axis=-1).reshape(B, J, H, W)

    # grid: deterministic coordinate grid in [-1, 1], channels = (y, x)
    ys = jnp.linspace(-1.0, 1.0, H, dtype=jnp.float32)
    xs = jnp.linspace(-1.0, 1.0, W, dtype=jnp.float32)
    yy, xx = jnp.meshgrid(ys, xs, indexing="ij")
    grid = jnp.broadcast_to(jnp.stack([yy, xx], axis=0), (B, G, H, W))
    # small per-batch perturbation so batches differ (still deterministic)
    grid = grid + 0.01 * jax.random.normal(k2, (B, G, H, W), dtype=jnp.float32)

    out = center_of_mass(grid, heatmaps, flip=True)
    out = jax.block_until_ready(out)

    # pure-JAX reference for the same semantics
    ref = jnp.einsum("bjhw,bghw->bjg", heatmaps, grid)[..., ::-1]
    assert out.shape == (B, J, G)
    assert out.dtype == jnp.float32
    assert jnp.allclose(out, ref, atol=1e-5, rtol=1e-5)

    # also exercise flip=False path
    out_nf = jax.block_until_ready(center_of_mass(grid, heatmaps, flip=False))
    ref_nf = jnp.einsum("bjhw,bghw->bjg", heatmaps, grid)
    assert jnp.allclose(out_nf, ref_nf, atol=1e-5, rtol=1e-5)

    print("KERNEL_OK")
</pallas_src>

<mosaic_0001>
module attributes {stable_mosaic.version = 11 : i64} {
  func.func @_com_kernel(%arg0: i32, %arg1: i32, %arg2: memref<1x4x256xf32, #tpu.memory_space<vmem>>, %arg3: memref<1x2x256xf32, #tpu.memory_space<vmem>>, %arg4: memref<1x4x2xf32, #tpu.memory_space<vmem>>, %arg5: memref<1x4x2xf32, #tpu.memory_space<vmem>>) attributes {dimension_semantics = [#tpu.dimension_semantics<parallel>, #tpu.dimension_semantics<arbitrary>], iteration_bounds = array<i64: 2, 1>, scalar_prefetch = 0 : i64, scratch_operands = 1 : i64, tpu.core_type = #tpu.core_type<tc>, window_params = [{transform_indices = @transform_0, window_bounds = array<i64: 1, 4, 256>}, {transform_indices = @transform_1, window_bounds = array<i64: 1, 2, 256>}, {transform_indices = @transform_2, window_bounds = array<i64: 1, 4, 2>}]} {
    %c0_i32 = arith.constant 0 : i32
    %0 = arith.cmpi eq, %arg1, %c0_i32 : i32
    %1 = arith.extui %0 : i1 to i32
    %c0_i32_0 = arith.constant 0 : i32
    %2 = arith.cmpi ne, %1, %c0_i32_0 : i32
    scf.if %2 {
      %cst_15 = arith.constant 0.000000e+00 : f32
      %22 = vector.broadcast %cst_15 : f32 to vector<1x4x2xf32>
      %c0_16 = arith.constant 0 : index
      %c0_17 = arith.constant 0 : index
      %c0_18 = arith.constant 0 : index
      %23 = vector.load %arg5[%c0_16, %c0_17, %c0_18] : memref<1x4x2xf32, #tpu.memory_space<vmem>>, vector<1x4x2xf32>
      tpu.vector_store %arg5[%c0_16, %c0_17, %c0_18], %22 {strides = array<i32>} : memref<1x4x2xf32, #tpu.memory_space<vmem>>, vector<1x4x2xf32>,
    } else {
    }
    %c0 = arith.constant 0 : index
    %c0_1 = arith.constant 0 : index
    %c0_2 = arith.constant 0 : index
    %3 = vector.load %arg2[%c0, %c0_1, %c0_2] : memref<1x4x256xf32, #tpu.memory_space<vmem>>, vector<1x4x256xf32>
    %c0_3 = arith.constant 0 : index
    %c0_4 = arith.constant 0 : index
    %c0_5 = arith.constant 0 : index
    %4 = vector.load %arg3[%c0_3, %c0_4, %c0_5] : memref<1x2x256xf32, #tpu.memory_space<vmem>>, vector<1x2x256xf32>
    %5 = vector.extract_strided_slice %4 {offsets = [0, 0, 0], sizes = [1, 1, 256], strides = [1, 1, 1]} : vector<1x2x256xf32> to vector<1x1x256xf32>
    %6 = vector.broadcast %5 : vector<1x1x256xf32> to vector<1x4x256xf32>
    %7 = arith.mulf %3, %6 : vector<1x4x256xf32>
    %cst = arith.constant dense<0.000000e+00> : vector<1x4xf32>
    %8 = vector.multi_reduction <add>, %7, %cst [2] : vector<1x4x256xf32> to vector<1x4xf32>
    %9 = vector.shape_cast %8 : vector<1x4xf32> to vector<1x4x1xf32>
    %10 = vector.extract_strided_slice %4 {offsets = [0, 1, 0], sizes = [1, 1, 256], strides = [1, 1, 1]} : vector<1x2x256xf32> to vector<1x1x256xf32>
    %11 = vector.broadcast %10 : vector<1x1x256xf32> to vector<1x4x256xf32>
    %12 = arith.mulf %3, %11 : vector<1x4x256xf32>
    %cst_6 = arith.constant dense<0.000000e+00> : vector<1x4xf32>
    %13 = vector.multi_reduction <add>, %12, %cst_6 [2] : vector<1x4x256xf32> to vector<1x4xf32>
    %14 = vector.shape_cast %13 : vector<1x4xf32> to vector<1x4x1xf32>
    %c0_7 = arith.constant 0 : index
    %c0_8 = arith.constant 0 : index
    %c0_9 = arith.constant 0 : index
    %15 = vector.load %arg5[%c0_7, %c0_8, %c0_9] : memref<1x4x2xf32, #tpu.memory_space<vmem>>, vector<1x4x2xf32>
    %16 = tpu.concatenate %14, %9 in 2 : vector<1x4x1xf32>, vector<1x4x1xf32> -> vector<1x4x2xf32>
    %17 = arith.addf %15, %16 : vector<1x4x2xf32>
    %c0_10 = arith.constant 0 : index
    %c0_11 = arith.constant 0 : index
    %c0_12 = arith.constant 0 : index
    %18 = vector.load %arg5[%c0_10, %c0_11, %c0_12] : memref<1x4x2xf32, #tpu.memory_space<vmem>>, vector<1x4x2xf32>
    tpu.vector_store %arg5[%c0_10, %c0_11, %c0_12], %17 {strides = array<i32>} : memref<1x4x2xf32, #tpu.memory_space<vmem>>, vector<1x4x2xf32>,
    %c0_i32_13 = arith.constant 0 : i32
    %19 = arith.cmpi eq, %arg1, %c0_i32_13 : i32
    %20 = arith.extui %19 : i1 to i32
    %c0_i32_14 = arith.constant 0 : i32
    %21 = arith.cmpi ne, %20, %c0_i32_14 : i32
    scf.if %21 {
      %c0_15 = arith.constant 0 : index
      %c0_16 = arith.constant 0 : index
      %c0_17 = arith.constant 0 : index
      %22 = vector.load %arg5[%c0_15, %c0_16, %c0_17] : memref<1x4x2xf32, #tpu.memory_space<vmem>>, vector<1x4x2xf32>
      %c0_18 = arith.constant 0 : index
      %c0_19 = arith.constant 0 : index
      %c0_20 = arith.constant 0 : index
      %23 = vector.load %arg4[%c0_18, %c0_19, %c0_20] : memref<1x4x2xf32, #tpu.memory_space<vmem>>, vector<1x4x2xf32>
      tpu.vector_store %arg4[%c0_18, %c0_19, %c0_20], %22 {strides = array<i32>} : memref<1x4x2xf32, #tpu.memory_space<vmem>>, vector<1x4x2xf32>,
    } else {
    }
    return
  }
  func.func @transform_0(%arg0: i32, %arg1: i32) -> (i32, i32, i32) {
    %c0_i32 = arith.constant 0 : i32
    %c0_i32_0 = arith.constant 0 : i32
    return %arg0, %c0_i32, %arg1 : i32, i32, i32
  }
  func.func @transform_1(%arg0: i32, %arg1: i32) -> (i32, i32, i32) {
    %c0_i32 = arith.constant 0 : i32
    %c0_i32_0 = arith.constant 0 : i32
    return %arg0, %c0_i32, %arg1 : i32, i32, i32
  }
  func.func @transform_2(%arg0: i32, %arg1: i32) -> (i32, i32, i32) {
    %c0_i32 = arith.constant 0 : i32
    %c0_i32_0 = arith.constant 0 : i32
    %c0_i32_1 = arith.constant 0 : i32
    return %arg0, %c0_i32, %c0_i32_0 : i32, i32, i32
  }
}

</mosaic_0001>

<bundles_post_ra>
// kernel: tpu_custom_call.1
= control target key start
LH: loop header
LB: loop body
LE: loop exit
PB: predicated region body
PF: predicated region fallthrough
CT: control target
= control target key end

     0   :  { %7 = vsyncpa [#allocation4], 0  ;;  %s745_s0 = inlined_call_operand.hbm [shape: f32[2,4,256], index: 0, kind: input, shape index: {}]   ;;  %s746_s1 = inlined_call_operand.hbm [shape: f32[2,2,256], index: 1, kind: input, shape index: {}]   ;;  %s747_s2 = inlined_call_operand.vmem [shape: f32[2,4,2], index: 2, kind: output, shape index: {}]  }
   0x1   :  { %9 = vsyncpa [#allocation4 + $0x1], 0 }
   0x2   :  { %10 = vsyncpa [#allocation6], 0 }
   0x3   :  { %12 = vsyncpa [#allocation6 + $0x1], 0  ;;  %s614_s9 = smov 0   ;;  %s616_s10 = smov 0  }
   0x4   :  { %s618_s11 = smov 0   ;;  %s620_s12 = smov 0  }
   0x5   :  { %s622_s13 = smov 0   ;;  %s624_s14 = smov 0  }
   0x6 LB: > { %s405_s15 = sadd.s32 4294967295, %s594_s14   ;;  %s30_s16 = sadd.s32 1, %s590_s13  ;;  %s594_s14 = sphi %s624_s14, %s18_s14   ;;  %s590_s13 = sphi %s622_s13, %s756_s13   ;;  %s586_s12 = sphi %s620_s12, %s755_s12   ;;  %s582_s11 = sphi %s618_s11, %s754_s11   ;;  %s578_s10 = sphi %s616_s10, %s753_s10   ;;  %s574_s9 = sphi %s614_s9, %s752_s9  }
   0x7   : > { %p32_p0 = scmp.ge.s32.totalorder %s30_s16, 2  ;;  %s39_s17 = sadd.s32 1, %s582_s11 }
   0x8   : > { %p46_p1 = scmp.ne.s32.totalorder %s582_s11, %s578_s10  ;;  %p47_p2 = scmp.eq.s32.totalorder %s594_s14, 0 }
   0x9   : > { %s758_s16 = smov (%p32_p0, %s30_s16), 0  ;;  %p52_p4 = scmp.ne.s32.totalorder %s578_s10, %s574_s9 }
   0xa   : > { %p650_p3 = por %p47_p2, %p46_p1  ;;  %s34_s19 = ssub.s32 %s590_s13, %s758_s16 }
   0xb   : > { %p53_p5 = scmp.eq.s32.totalorder %s405_s15, 0  ;;  %p37_p6 = scmp.eq.s32.totalorder %s34_s19, 0 }
   0xc   : > { %p434_p8 = scmp.lt.s32.totalorder %s594_s14, 2  ;;  %s666_s22 = sand.u32 1, %s582_s11  }
   0xd   : > { %p657_p7 = por %p53_p5, %p52_p4  ;;  %s421_s23 = sshll.u32 %s590_s13, 7 }
   0xe   : > { %s663_s21 = scalar_select %p37_p6, %s582_s11, %s39_s17  }
   0xf   : > { %s409_s24 = sshll.u32 %s666_s22, 3  ;;  %s142_s27 = scalar_lea.hbm %s745_s0, %s421_s23 }
  0x10   : > { %s134_s28 = scalar_lea.vmem [#allocation3], %s409_s24  ;;  %p675_p9 = pnand %p434_p8, %p650_p3 }
  0x11   : > { %s144_s29 = sshll.u32 %s134_s28, 4  ;;  %p415_p10 = scmp.ge.s32.totalorder %s594_s14, 1  ;;  %s145_s29 = int_to_ptr.vmem [resolvable:$true] %s144_s29 }
  0x12   : > { %p170_p11 = scmp.lt.s32.totalorder %s594_s14, 3  ;;  %s131_s3 = scalar_lea.sflag [#allocation4], %s666_s22 }
  0x13   : > { %p486_p12 = pneg %p675_p9  ;;  %s497_s4 = scalar_lea.vmem %s145_s29, 128 }
  0x14   : > { %p498_p13 = scmp.ne.s32.totalorder %s145_s29, %s497_s4  ;;  %s596_s5 = smov [#allocation3]  }
  0x15   : > { %s502_s6 = sshll.u32 %s596_s5, 4  ;;  %s503_s6 = int_to_ptr.vmem [resolvable:$false] %s502_s6 }
  0x16   : > { %p500_p0 = pnand %p498_p13, %p486_p12  ;;  %s504_s7 = scalar_lea.vmem %s503_s6, 256 }
  0x17   : > { %p505_p2 = scmp.lt.s32.totalorder %s145_s29, %s503_s6  ;;  %p506_p3 = scmp.lt.s32.totalorder %s504_s7, %s497_s4 }
  0x18   : > { %p501_p1 = pneg %p500_p0 }
  0x19   : > { %p507_p4 = por %p506_p3, %p505_p2 }
  0x1b   : > { %p508_p5 = pnand %p507_p4, %p501_p1 }
  0x1d   : > { %511 = shalt.err (!%p508_p5)
}
  0x1e   : > { %430 = dma.hbm_to_vmem [thread:$0]  (!%p675_p9), %s142_s27, 128, %s145_s29, %s131_s3  }
  0x1f   : > { %p693_p6 = pnand %p415_p10, %p170_p11  ;;  %s412_s9 = sshll.u32 %s666_s22, 2 }
  0x20   : > { %s422_s15 = sshll.u32 %s590_s13, 6  ;;  %s155_s23 = scalar_lea.vmem [#allocation5], %s412_s9 }
  0x21   : > { %s163_s19 = scalar_lea.hbm %s746_s1, %s422_s15  ;;  %s165_s24 = sshll.u32 %s155_s23, 4  ;;  %s166_s24 = int_to_ptr.vmem [resolvable:$true] %s165_s24 }
  0x22   : > { %s152_s25 = scalar_lea.sflag [#allocation6], %s666_s22  ;;  %s525_s26 = scalar_lea.vmem %s166_s24, 64 }
  0x23   : > { %p526_p8 = scmp.ne.s32.totalorder %s166_s24, %s525_s26  ;;  %s597_s27 = smov [#allocation5]  }
  0x24   : > { %s530_s28 = sshll.u32 %s597_s27, 4  ;;  %s531_s28 = int_to_ptr.vmem [resolvable:$false] %s530_s28 }
  0x25   : > { %p528_p13 = pnand %p526_p8, %p486_p12  ;;  %s532_s29 = scalar_lea.vmem %s531_s28, 128 }
  0x26   : > { %p533_p10 = scmp.lt.s32.totalorder %s166_s24, %s531_s28  ;;  %p534_p11 = scmp.lt.s32.totalorder %s532_s29, %s525_s26 }
  0x27   : > { %p529_p0 = pneg %p528_p13 }
  0x28   : > { %p535_p1 = por %p534_p11, %p533_p10 }
  0x2a   : > { %p536_p2 = pnand %p535_p1, %p529_p0 }
  0x2c   : > { %539 = shalt.err (!%p536_p2)
}
  0x2d   : > { %433 = dma.hbm_to_vmem [thread:$0]  (!%p675_p9), %s163_s19, 64, %s166_s24, %s152_s25  }
  0x2e   : > { %174 = sbr.rel (%p693_p6) target bundleno = 228 (0xe4), region = 28  ;;  %s176_s22 = sand.u32 (!%p693_p6), 1, %s578_s10  }
  0x2f   : > { %s416_s3 = sshll.u32 (!%p693_p6), %s176_s22, 3  ;;  %s177_s4 = scalar_lea.sflag (!%p693_p6), [#allocation4], %s176_s22 }
  0x30   : > { %s180_s5 = scalar_lea.vmem (!%p693_p6), [#allocation3], %s416_s3 }
  0x33   : > { %565 = dma.done.wait (%p657_p7), %s177_s4, 128  }
  0x34   : > { %567 = vsyncadd (%p657_p7), %s177_s4, 4294967168  ;;  %s417_s6 = sshll.u32 %s176_s22, 2  ;;  %s186_s7 = scalar_lea.sflag [#allocation6], %s176_s22 }
  0x35   : > { %s189_s9 = scalar_lea.vmem [#allocation5], %s417_s6 }
  0x36   : > { %569 = dma.done.wait (%p657_p7), %s186_s7, 64  }
  0x37   : > { %571 = vsyncadd (%p657_p7), %s186_s7, 4294967232  ;;  %vm224_vm0 = vcmask 11264   ;;  %v229_v0 = vlaneseq  ;;  %v598_v1 = vmov 0.0   ;;  %v227_v7 = vld [vmem:[%s189_s9] sm:$0xf]  ;;  %v226_v16 = vld [vmem:[%s180_s5] sm:$0xff] }
  0x38   : > { %225 = vst.msk [vmem:[#allocation2] sm:$0xf] %vm224_vm0, %v598_v1  ;;  %vm255_vm1 = vcmask 1043456   ;;  %p216_p7 = scmp.lt.s32.totalorder %s586_s12, 1  ;;  %vm293_vm2 = vcmask 7168  }
  0x39   : > { %v230_v2 = vshrl.u32 %v229_v0, 7 }
  0x3a   : > { %s760_s12 = smov (!%p216_p7, %s586_s12), 1 }
  0x3b   : > { %v231_v3 = vsub.s32 0, %v230_v2  ;;  %v235_v4 = vsub.s32 2, %v230_v2  ;;  %v263_v5 = vsub.s32 1, %v230_v2  ;;  %v267_v6 = vsub.s32 3, %v230_v2  ;;  %s418_s20 = sshll.u32 %s760_s12, 2 }
  0x3c   : > { %s219_s15 = scalar_lea.vmem %s747_s2, %s418_s20 }
  0x3d   : > { %v232_v8 = vrot.slane %v227_v7, %v231_v3  ;;  %v236_v9 = vrot.slane %v227_v7, %v235_v4  ;;  %v264_v10 = vrot.slane %v227_v7, %v263_v5  ;;  %v268_v11 = vrot.slane %v227_v7, %v267_v6 }
  0x3f   : > { %v242_v12 = vrot.slane %v232_v8, %v231_v3  ;;  %v246_v13 = vrot.slane %v236_v9, %v231_v3  ;;  %v274_v14 = vrot.slane %v264_v10, %v263_v5  ;;  %v278_v15 = vrot.slane %v268_v11, %v263_v5  ;;  %v292_v30 = vld [vmem:[#allocation2] sm:$0xf] }
  0x41   : > { %v249_v17 = vcombine.low %v242_v12, %v246_v13  ;;  %v281_v18 = vcombine.low %v274_v14, %v278_v15 }
  0x43   : > { %v251_v19 = vmul.f32 %v249_v17, %v226_v16  ;;  %v283_v20 = vmul.f32 %v281_v18, %v226_v16 }
  0x45   : > { %v253_v21 = vcombine.high %v251_v19, %v251_v19  ;;  %v256_v22 = vsel %vm255_vm1, %v251_v19, 0.0  ;;  %v285_v23 = vcombine.high %v283_v20, %v283_v20  ;;  %v287_v25 = vsel %vm255_vm1, %v283_v20, 0.0 }
  0x47   : > { %v257_v24 = vsel %vm255_vm1, %v253_v21, 0.0  ;;  %v288_v26 = vsel %vm255_vm1, %v285_v23, 0.0 }
  0x48   : > { %v258_v27 = vadd.f32 %v257_v24, %v256_v22  ;;  %v289_v28 = vadd.f32 %v288_v26, %v287_v25 }
  0x4a   : > { %259 = vadd.xlane.f32.xlu0 %v258_v27 }
  0x4e   : > { %290 = vadd.xlane.f32.xlu0 %v289_v28 }
  0xd3   : > { %v260_v29 = vpop.xlane.xlu0 %259 }
  0xd7   : > { %v291_v31 = vpop.xlane.xlu0 %290 }
  0xd8   : > { %v294_v32 = vsel %vm293_vm2, %v291_v31, %v260_v29 }
  0xd9   : > { %v295_v33 = vadd.f32 %v294_v32, %v292_v30 }
  0xdb   : > { %297 = vst.msk [vmem:[#allocation2] sm:$0xf] %vm224_vm0, %v295_v33 }
  0xe2   : > { %v301_v34 = vld [vmem:[#allocation2] sm:$0xf] }
  0xe3   : > { %302 = vst.msk [vmem:[%s219_s15] sm:$0xf] %vm224_vm0, %v301_v34 }
  0xe4 PF: > { %s18_s14 = sadd.s32 1, %s594_s14   ;;  %s752_s9 = smov %s578_s10 }
  0xe5   : > { %p15_p9 = scmp.ge.s32.totalorder %s18_s14, 4   ;;  %s753_s10 = smov %s582_s11 }
  0xe6   : > { %s754_s11 = smov %s663_s21  ;;  %s755_s12 = smov %s590_s13 }
  0xe7   : > { %s756_s13 = smov %s758_s16  ;;  %17 = sbr.rel (!%p15_p9) target bundleno = 6 (0x6), region = 89 }
  0xec   :  { %322 = vsyncpa [#allocation4], 1 }
  0xed   :  { %324 = vsyncpa [#allocation4 + $0x1], 1 }
  0xee   :  { %325 = vsyncpa [#allocation6], 1 }
  0xef   :  { %327 = vsyncpa [#allocation6 + $0x1], 1 }

</bundles_post_ra>
